<compile_context>
chip_gen: v7x
topology: tpu7x:2x2x1
jax: 0.10.0
libtpu: 0.0.40
codegen_flags: <defaults>
</compile_context>

<pallas_src>
import functools

import jax
import jax.numpy as jnp
from jax.experimental import pallas as pl
from jax.experimental.pallas import tpu as pltpu


def _rmsnorm_kernel(x_ref, g_ref, o_ref, *, scale_sq, eps_sq, native_scale):
    # x_ref: (block_rows, dim); g_ref: (1, dim).
    x = x_ref[...]
    x32 = x.astype(jnp.float32)
    # Sum-of-squares always accumulated in f32 (lane-axis reduce -> XLU slot).
    ssq = jnp.sum(x32 * x32, axis=-1, keepdims=True)
    # clamp(||x|| * scale, eps) == sqrt(clamp(ssq * scale^2, eps^2)); fuse the
    # sqrt/clamp/divide tail into one EUP rsqrt + one compare.
    inv = jax.lax.rsqrt(jnp.maximum(ssq * scale_sq, eps_sq))
    if native_scale:
        # bf16 VPU path (v6e/v7x): scale in the native dtype, avoiding the
        # full-size f32 product temporaries that limit block size.
        o_ref[...] = (x * inv.astype(x.dtype) * g_ref[...]).astype(o_ref.dtype)
    else:
        # f32 path (f32 inputs, or v5e which has no bf16 VPU).
        o_ref[...] = (x32 * inv * g_ref[...]).astype(o_ref.dtype)


def _sublane_align(dtype) -> int:
    itemsize = jnp.dtype(dtype).itemsize
    if itemsize >= 4:
        return 8
    if itemsize == 2:
        return 16
    return 32


def _tpu_params():
    """Returns (generation or None, scoped-VMEM limit bytes to request)."""
    gen = None
    try:
        kind = jax.devices()[0].device_kind.lower()
        for g in (7, 6, 5, 4):
            if (f"v{g}" in kind) or (f"tpu{g}" in kind):
                gen = g
                break
    except Exception:
        gen = None
    # Optional refinement of VMEM capacity via trace-time query.
    vmem_capacity = None
    try:
        vmem_capacity = pltpu.get_tpu_info().vmem_capacity_bytes
    except Exception:
        vmem_capacity = None

    if gen is not None and gen >= 7:
        limit = 48 << 20          # 64 MiB physical per TC on v7x -> leave headroom
    elif gen in (5, 6):
        limit = 64 << 20          # 128 MiB physical on v5e/v6e
    else:
        limit = 32 << 20          # conservative default
    if vmem_capacity is not None:
        limit = min(limit, int(vmem_capacity * 0.75))
    return gen, limit


def _pick_block_rows(rows, dim, dtype, native_scale, vmem_budget_bytes,
                     target_block_bytes):
    """Row tile sized for ~target_block_bytes of input per grid step, capped by
    the true per-step VMEM footprint (2x in double-buffered + 2x out + f32
    upcast temporaries)."""
    align = _sublane_align(dtype)
    itemsize = jnp.dtype(dtype).itemsize
    in_bytes_per_row = dim * itemsize
    f32_bytes_per_row = dim * 4
    if itemsize >= 4:
        f32_temps = 2          # x*x and the pre-store product
    elif native_scale:
        f32_temps = 2          # x32 and x32*x32 only; scaling stays native
    else:
        f32_temps = 3          # x32, x32*x32, x32*inv*g32
    per_row_footprint = 4 * in_bytes_per_row + f32_temps * f32_bytes_per_row

    budget = int(vmem_budget_bytes * 0.75)   # headroom for compiler scratch
    br = min(max(1, target_block_bytes // max(in_bytes_per_row, 1)),
             max(1, budget // max(per_row_footprint, 1)))
    # TODO(synk): for very wide dim where even `align` rows exceed the budget,
    # switch to a 2-D grid with a lane-axis reduction block + ssq accumulator.
    br = max(align, (br // align) * align)
    rows_aligned = ((rows + align - 1) // align) * align
    return int(min(br, rows_aligned))


def rmsnorm(x, g, eps=1e-8):
    """RMSNorm matching the torch module: x / clamp(||x||_2 * dim^-0.5, eps) * g.

    x: (..., dim) float array, g: (dim,) gain.
    For production performance `dim` should be a multiple of 128 (lane-dense
    stores); other sizes are still correct.
    """
    dim = x.shape[-1]
    orig_shape = x.shape
    rows = 1
    for s in orig_shape[:-1]:
        rows *= s
    x2 = x.reshape(rows, dim)

    gen, vmem_limit = _tpu_params()
    itemsize = jnp.dtype(x.dtype).itemsize
    # bf16-native scaling only where the VPU supports it (v6e/v7x), never v5e.
    native_scale = bool(gen is not None and gen >= 6 and itemsize == 2
                        and jnp.issubdtype(x.dtype, jnp.floating))
    g2 = g.reshape(1, dim).astype(x.dtype if native_scale else jnp.float32)

    target_block_bytes = (6 << 20) if (gen is not None and gen >= 7) else (4 << 20)
    block_rows = _pick_block_rows(rows, dim, x.dtype, native_scale,
                                  vmem_limit, target_block_bytes)

    # v7x megacore: keep at least 2 row blocks so both TensorCores get work.
    align = _sublane_align(x.dtype)
    if gen is not None and gen >= 7 and rows > align:
        if pl.cdiv(rows, block_rows) < 2:
            half = -(-rows // 2)
            block_rows = max(align, ((half + align - 1) // align) * align)

    grid = (pl.cdiv(rows, block_rows),)   # ragged last block is fine (per-row op)

    kernel = functools.partial(
        _rmsnorm_kernel,
        scale_sq=1.0 / float(dim),        # (dim ** -0.5) ** 2
        eps_sq=float(eps) ** 2,
        native_scale=native_scale,
    )

    out = pl.pallas_call(
        kernel,
        out_shape=jax.ShapeDtypeStruct((rows, dim), x.dtype),
        grid_spec=pltpu.PrefetchScalarGridSpec(
            num_scalar_prefetch=0,
            grid=grid,
            in_specs=[
                pl.BlockSpec((block_rows, dim), lambda i: (i, 0)),
                pl.BlockSpec((1, dim), lambda i: (0, 0)),   # g stays resident
            ],
            out_specs=pl.BlockSpec((block_rows, dim), lambda i: (i, 0)),
        ),
        compiler_params=pltpu.CompilerParams(
            dimension_semantics=("parallel",),   # shards row blocks across TCs
            vmem_limit_bytes=vmem_limit,
        ),
    )(x2, g2)

    return out.reshape(orig_shape)


def _rmsnorm_ref(x, g, eps=1e-8):
    dim = x.shape[-1]
    scale = dim ** (-0.5)
    norm = jnp.sqrt(jnp.sum(x.astype(jnp.float32) ** 2, axis=-1, keepdims=True)) * scale
    norm = jnp.maximum(norm, eps)
    return (x / norm * g).astype(x.dtype)


if __name__ == "__main__":
    key = jax.random.PRNGKey(0)
    batch, seq, hidden = 2, 8, 32
    x = jax.random.normal(key, (batch, seq, hidden), dtype=jnp.float32)
    # nn.Parameter(torch.ones(dim)) -> deterministic init of ones
    g = jnp.ones((hidden,), dtype=jnp.float32)

    out = rmsnorm(x, g)
    out = jax.block_until_ready(out)

    ref = _rmsnorm_ref(x, g)
    assert out.shape == x.shape and out.dtype == x.dtype
    assert jnp.allclose(out, ref, atol=1e-5, rtol=1e-5)
    print("KERNEL_OK")
</pallas_src>

<mosaic_0001>
module attributes {stable_mosaic.version = 11 : i64} {
  func.func @_rmsnorm_kernel(%arg0: i32, %arg1: memref<16x32xf32, #tpu.memory_space<vmem>>, %arg2: memref<1x32xf32, #tpu.memory_space<vmem>>, %arg3: memref<16x32xf32, #tpu.memory_space<vmem>>) attributes {dimension_semantics = [#tpu.dimension_semantics<parallel>], iteration_bounds = array<i64: 1>, scalar_prefetch = 0 : i64, scratch_operands = 0 : i64, tpu.core_type = #tpu.core_type<tc>, window_params = [{transform_indices = @transform_0, window_bounds = array<i64: 16, 32>}, {pipeline_mode = #tpu.pipeline_mode<synchronous>, transform_indices = @transform_1, window_bounds = array<i64: 1, 32>}, {transform_indices = @transform_2, window_bounds = array<i64: 16, 32>}]} {
    %c0 = arith.constant 0 : index
    %c0_0 = arith.constant 0 : index
    %0 = vector.load %arg1[%c0, %c0_0] : memref<16x32xf32, #tpu.memory_space<vmem>>, vector<16x32xf32>
    %1 = arith.mulf %0, %0 : vector<16x32xf32>
    %cst = arith.constant dense<0.000000e+00> : vector<16xf32>
    %2 = vector.multi_reduction <add>, %1, %cst [1] : vector<16x32xf32> to vector<16xf32>
    %3 = vector.shape_cast %2 : vector<16xf32> to vector<16x1xf32>
    %cst_1 = arith.constant 3.125000e-02 : f32
    %4 = vector.broadcast %cst_1 : f32 to vector<16x1xf32>
    %5 = arith.mulf %3, %4 : vector<16x1xf32>
    %cst_2 = arith.constant 1.000000e-16 : f32
    %6 = vector.broadcast %cst_2 : f32 to vector<16x1xf32>
    %7 = arith.maximumf %5, %6 : vector<16x1xf32>
    %8 = math.rsqrt %7 : vector<16x1xf32>
    %9 = vector.broadcast %8 : vector<16x1xf32> to vector<16x32xf32>
    %10 = arith.mulf %0, %9 : vector<16x32xf32>
    %c0_3 = arith.constant 0 : index
    %c0_4 = arith.constant 0 : index
    %11 = vector.load %arg2[%c0_3, %c0_4] : memref<1x32xf32, #tpu.memory_space<vmem>>, vector<1x32xf32>
    %12 = vector.broadcast %11 : vector<1x32xf32> to vector<16x32xf32>
    %13 = arith.mulf %10, %12 : vector<16x32xf32>
    %c0_5 = arith.constant 0 : index
    %c0_6 = arith.constant 0 : index
    %14 = vector.load %arg3[%c0_5, %c0_6] : memref<16x32xf32, #tpu.memory_space<vmem>>, vector<16x32xf32>
    tpu.vector_store %arg3[%c0_5, %c0_6], %13 {strides = array<i32>} : memref<16x32xf32, #tpu.memory_space<vmem>>, vector<16x32xf32>,
    return
  }
  func.func @transform_0(%arg0: i32) -> (i32, i32) {
    %c0_i32 = arith.constant 0 : i32
    %c0_i32_0 = arith.constant 0 : i32
    return %arg0, %c0_i32 : i32, i32
  }
  func.func @transform_1(%arg0: i32) -> (i32, i32) {
    %c0_i32 = arith.constant 0 : i32
    %c0_i32_0 = arith.constant 0 : i32
    %c0_i32_1 = arith.constant 0 : i32
    return %c0_i32, %c0_i32_0 : i32, i32
  }
  func.func @transform_2(%arg0: i32) -> (i32, i32) {
    %c0_i32 = arith.constant 0 : i32
    %c0_i32_0 = arith.constant 0 : i32
    return %arg0, %c0_i32 : i32, i32
  }
}

</mosaic_0001>

<bundles_post_ra>
// kernel: tpu_custom_call.1
= control target key start
LH: loop header
LB: loop body
LE: loop exit
PB: predicated region body
PF: predicated region fallthrough
CT: control target
= control target key end

     0   :  { %7 = vsyncpa [#allocation3], 0  ;;  %s186_s0 = inlined_call_operand.hbm [shape: f32[16,32], index: 0, kind: input, shape index: {}]   ;;  %s187_s1 = inlined_call_operand.vmem [shape: f32[1,32], index: 1, kind: input, shape index: {}]   ;;  %s188_s2 = inlined_call_operand.hbm [shape: f32[16,32], index: 2, kind: output, shape index: {}]  }
   0x1   :  { %8 = vsyncpa [#allocation4], 0  ;;  %s130_s9 = smov [#allocation2]   ;;  %s82_s13 = scalar_lea.hbm %s186_s0, 256 }
   0x2   :  { %s14_s10 = sshll.u32 %s130_s9, 4  ;;  %p83_p0 = scmp.ne.s32.totalorder %s186_s0, %s82_s13  ;;  %s15_s10 = int_to_ptr.vmem [resolvable:$true] %s14_s10 }
   0x3   :  { %p86_p1 = scmp.lt.u32.totalorder %s82_s13, %s186_s0 }
   0x5   :  { %p88_p2 = pnand %p86_p1, %p83_p0 }
   0x7   :  { %91 = shalt.err (!%p88_p2)
}
   0x8   :  { %s92_s18 = scalar_lea.vmem %s15_s10, 256  ;;  %p97_p4 = scmp.lt.s32.totalorder %s15_s10, %s15_s10 }
   0x9   :  { %p93_p3 = scmp.ne.s32.totalorder %s15_s10, %s92_s18  ;;  %p98_p5 = scmp.lt.s32.totalorder %s92_s18, %s92_s18 }
   0xb   :  { %p99_p6 = por %p98_p5, %p97_p4 }
   0xd   :  { %p100_p7 = pnand %p99_p6, %p93_p3 }
   0xf   :  { %103 = shalt.err (!%p100_p7)
}
  0x10   :  { %s131_s19 = smov 128   ;;  %s132_s20 = smov 8  }
  0x11   :  { %20 = dma.hbm_to_vmem [thread:$0]  %s186_s0, 256, %s15_s10, [#allocation3], %s131_s19, %s131_s19, %s132_s20  }
  0x12   :  { %126 = dma.done.wait [#allocation3], 256  }
  0x13   :  { %127 = vsyncadd [#allocation3], 4294967040  ;;  %v26_v0 = vld [vmem:[#allocation2] sm:$0xff]  ;;  %vm30_vm0 = vcmask 261120   ;;  %v27_v1 = vld [vmem:[#allocation2 + $0x8] sm:$0xff]  ;;  %s133_s24 = smov [#allocation5]  }
  0x14   :  { %v28_v2 = vmul.f32 %v26_v0, %v26_v0  ;;  %v29_v3 = vmul.f32 %v27_v1, %v27_v1  ;;  %v73_v13 = vld [vmem:[%s187_s1] ss:$0 sm:$0xff]  ;;  %s61_s25 = sshll.u32 %s133_s24, 4  ;;  %s62_s25 = int_to_ptr.vmem [resolvable:$true] %s61_s25 }
  0x15   :  { %s104_s26 = scalar_lea.vmem %s62_s25, 256  ;;  %p109_p9 = scmp.lt.s32.totalorder %s62_s25, %s62_s25 }
  0x16   :  { %v31_v4 = vsel %vm30_vm0, %v28_v2, 0.0  ;;  %v34_v5 = vsel %vm30_vm0, %v29_v3, 0.0  ;;  %p105_p8 = scmp.ne.s32.totalorder %s62_s25, %s104_s26  ;;  %p110_p10 = scmp.lt.s32.totalorder %s104_s26, %s104_s26 }
  0x17   :  { %32 = vadd.xlane.f32.xlu0 %v31_v4 }
  0x18   :  { %p111_p11 = por %p110_p10, %p109_p9 }
  0x1a   :  { %p112_p12 = pnand %p111_p11, %p105_p8 }
  0x1b   :  { %35 = vadd.xlane.f32.xlu0 %v34_v5 }
  0xa4   :  { %v33_v6 = vpop.xlane.xlu0 %32 }
  0xa5   :  { %v37_v7 = vmul.f32 0.03125, %v33_v6 }
  0xa7   :  { %v39_v8 = vmax.f32 %v37_v7, 1e-16 }
  0xa8   :  { %v36_v9 = vpop.xlane.xlu0 %35 }
  0xa9   :  { %78 = vrsqrt.f32 %v39_v8  ;;  %v38_v10 = vmul.f32 0.03125, %v36_v9 }
  0xab   :  { %v40_v11 = vmax.f32 %v38_v10, 1e-16 }
  0xad   :  { %80 = vrsqrt.f32 %v40_v11 }
  0xb3   :  { %v79_v12 = vpop.eup %78 }
  0xb4   :  { %v43_v14 = vmul.f32 %v79_v12, %v26_v0 }
  0xb6   :  { %v52_v15 = vmul.f32 %v73_v13, %v43_v14 }
  0xb7   :  { %v81_v16 = vpop.eup %80 }
  0xb8   :  { %v44_v17 = vmul.f32 %v81_v16, %v27_v1  ;;  %54 = vst.msk [vmem:[#allocation5] sm:$0xff] %vm30_vm0, %v52_v15 }
  0xba   :  { %v53_v18 = vmul.f32 %v73_v13, %v44_v17 }
  0xbc   :  { %55 = vst.msk [vmem:[#allocation5 + $0x8] sm:$0xff] %vm30_vm0, %v53_v18 }
  0xbd   :  { %115 = shalt.err (!%p112_p12)
}
  0xbe   :  { %s116_s28 = scalar_lea.hbm %s188_s2, 256 }
  0xbf   :  { %p117_p13 = scmp.ne.s32.totalorder %s188_s2, %s116_s28  ;;  %p120_p0 = scmp.lt.u32.totalorder %s116_s28, %s188_s2 }
  0xc1   :  { %p122_p1 = pnand %p120_p0, %p117_p13 }
  0xc3   :  { %125 = shalt.err (!%p122_p1)
}
  0xc4   :  { %67 = dma.vmem_to_hbm [thread:$0]  %s62_s25, 256, %s188_s2, [#allocation4], %s131_s19, %s131_s19, %s132_s20  }
  0xc5   :  { %128 = dma.done.wait [#allocation4], 256  }
  0xc6   :  { %129 = vsyncadd [#allocation4], 4294967040 }
  0xc7   :  { %71 = vsyncpa [#allocation3], 1 }
  0xc8   :  { %72 = vsyncpa [#allocation4], 1 }

</bundles_post_ra>
